<compile_context>
chip_gen: v7x
topology: tpu7x:2x2x1
jax: 0.10.0
libtpu: 0.0.40
codegen_flags: <defaults>
</compile_context>

<pallas_src>
import functools

import numpy as np
import jax
import jax.numpy as jnp
from jax.experimental import pallas as pl
from jax.experimental.pallas import tpu as pltpu

SIGMA = 9.0      # ctpn_loss(sigma) constructor argument
A_MAX = 8192     # max anchors handled per grid step (lane tile for score/labels)
LANES = 512      # lane width of the flattened regression slabs (128 anchors/row)


def _ctpn_loss_kernel(score_ref, lbl_ref, reg_ref, tgt_ref, iw_ref, ow_ref,
                      out_ref, acc_cls_ref, acc_reg_ref, *, sigma):
    """Vector-accumulates CE / smooth-L1 partials; finalizes on the last step."""
    step = pl.program_id(0)

    @pl.when(step == 0)
    def _():
        acc_cls_ref[...] = jnp.zeros_like(acc_cls_ref)
        acc_reg_ref[...] = jnp.zeros_like(acc_reg_ref)

    # ---- classification: 2-class cross entropy, per-anchor along lanes ----
    labels = lbl_ref[...]                                   # (1, A)
    keep = (labels != -1.0).astype(jnp.float32)             # kept anchors
    fg = (labels == 1.0).astype(jnp.float32)                # foreground anchors

    l0 = score_ref[0:1, :]                                  # (1, A)
    l1 = score_ref[1:2, :]                                  # (1, A)
    # CE = logsumexp(l0, l1) - l_label  ==  softplus(l_other - l_chosen)
    z = jnp.where(labels == 1.0, l0 - l1, l1 - l0)
    ce = (jnp.maximum(z, 0.0) + jnp.log1p(jnp.exp(-jnp.abs(z)))) * keep

    acc_cls_ref[0:1, :] += ce                               # per-lane CE partials
    acc_cls_ref[1:2, :] += keep                             # per-lane keep counts
    acc_cls_ref[2:3, :] += fg                               # per-lane fg counts

    # ---- regression: smooth-L1 on lane-dense flattened tiles ----
    # keep mask already folded into ow by the wrapper, so no per-anchor
    # structure is needed here.
    d = jnp.abs((tgt_ref[...] - reg_ref[...]) * iw_ref[...])      # (tm, LANES)
    lr = jnp.where(d < (1.0 / sigma), 0.5 * d * d * sigma, d - 0.5 / sigma)
    acc_reg_ref[...] += lr * ow_ref[...]

    # ---- finalize: single cross-lane reduction + scalar SMEM writes ----
    @pl.when(step == pl.num_programs(0) - 1)
    def _():
        ce_sum = jnp.sum(acc_cls_ref[0:1, :])
        keep_sum = jnp.sum(acc_cls_ref[1:2, :])
        fg_sum = jnp.sum(acc_cls_ref[2:3, :])
        reg_sum = jnp.sum(acc_reg_ref[...])
        # CrossEntropyLoss(reduction='mean') over kept anchors, clamp [0, 10]
        loss_cls = jnp.clip(ce_sum / keep_sum, 0.0, 10.0)
        # sum(smooth_l1) / (num_fg + 1), clamp [0, 1]
        loss_reg = jnp.clip(reg_sum / (fg_sum + 1.0), 0.0, 1.0)
        out_ref[0] = loss_cls + loss_reg
        out_ref[1] = loss_cls
        out_ref[2] = loss_reg


def ctpn_loss(pre_score, pre_reg, rpn_labels, rpn_bbox_targets,
              rpn_bbox_inside_weights, rpn_bbox_outside_weights,
              sigma=SIGMA):
    # PyTorch-equivalent flattening (glue, plain JAX; reshapes are free)
    score = pre_score.reshape(-1, 2).astype(jnp.float32)
    reg = pre_reg.reshape(-1, 4).astype(jnp.float32)
    lbl = rpn_labels.reshape(-1).astype(jnp.float32)
    tgt = rpn_bbox_targets.reshape(-1, 4).astype(jnp.float32)
    iw = rpn_bbox_inside_weights.reshape(-1, 4).astype(jnp.float32)
    ow = rpn_bbox_outside_weights.reshape(-1, 4).astype(jnp.float32)

    n = score.shape[0]
    # anchors per grid step: multiple of 128; one step covers everything for
    # small inputs, capped at A_MAX for large ones.
    if n <= A_MAX:
        anchors_per_step = max(128, ((n + 127) // 128) * 128)
    else:
        anchors_per_step = A_MAX
    n_pad = ((n + anchors_per_step - 1) // anchors_per_step) * anchors_per_step
    pad = n_pad - n

    # Fold the per-anchor keep mask into the outside weights so the regression
    # stream needs no per-anchor masking (and no transpose) inside the kernel.
    keep = (lbl != -1.0).astype(jnp.float32)
    ow = ow * keep[:, None]

    if pad:
        score = jnp.pad(score, ((0, pad), (0, 0)))
        reg = jnp.pad(reg, ((0, pad), (0, 0)))
        tgt = jnp.pad(tgt, ((0, pad), (0, 0)))
        iw = jnp.pad(iw, ((0, pad), (0, 0)))
        ow = jnp.pad(ow, ((0, pad), (0, 0)))          # padded anchors contribute 0
        lbl = jnp.pad(lbl, (0, pad), constant_values=-1.0)  # padded anchors ignored

    # Small arrays: score transposed to (2, N) (only physical transpose, 8 B/anchor),
    # labels as a free (1, N) reshape.
    score_t = score.T
    lbl2 = lbl.reshape(1, -1)

    # Heavy arrays: free contiguous reshape (N, 4) -> (N*4/LANES, LANES).
    rows = (n_pad * 4) // LANES
    reg_f = reg.reshape(rows, LANES)
    tgt_f = tgt.reshape(rows, LANES)
    iw_f = iw.reshape(rows, LANES)
    ow_f = ow.reshape(rows, LANES)

    tm = (anchors_per_step * 4) // LANES          # regression rows per grid step
    grid = (n_pad // anchors_per_step,)

    out = pl.pallas_call(
        functools.partial(_ctpn_loss_kernel, sigma=float(sigma)),
        out_shape=jax.ShapeDtypeStruct((3,), jnp.float32),
        grid_spec=pltpu.PrefetchScalarGridSpec(
            num_scalar_prefetch=0,
            grid=grid,
            in_specs=[
                pl.BlockSpec((2, anchors_per_step), lambda i: (0, i)),
                pl.BlockSpec((1, anchors_per_step), lambda i: (0, i)),
                pl.BlockSpec((tm, LANES), lambda i: (i, 0)),
                pl.BlockSpec((tm, LANES), lambda i: (i, 0)),
                pl.BlockSpec((tm, LANES), lambda i: (i, 0)),
                pl.BlockSpec((tm, LANES), lambda i: (i, 0)),
            ],
            out_specs=pl.BlockSpec(memory_space=pltpu.MemorySpace.SMEM),
            scratch_shapes=[
                pltpu.VMEM((4, anchors_per_step), jnp.float32),  # ce/keep/fg lane partials
                pltpu.VMEM((tm, LANES), jnp.float32),            # smooth-L1 partials
            ],
        ),
        compiler_params=pltpu.CompilerParams(
            dimension_semantics=("arbitrary",)),
    )(score_t, lbl2, reg_f, tgt_f, iw_f, ow_f)
    return out[0], out[1], out[2]


def _reference(pre_score, pre_reg, rpn_labels, rpn_bbox_targets,
               rpn_bbox_inside_weights, rpn_bbox_outside_weights, sigma=SIGMA):
    """Plain-JAX replica of the PyTorch forward (for correctness check)."""
    score = pre_score.reshape(-1, 2).astype(jnp.float32)
    reg = pre_reg.reshape(-1, 4).astype(jnp.float32)
    lbl = rpn_labels.reshape(-1).astype(jnp.float32)
    tgt = rpn_bbox_targets.reshape(-1, 4).astype(jnp.float32)
    iw = rpn_bbox_inside_weights.reshape(-1, 4).astype(jnp.float32)
    ow = rpn_bbox_outside_weights.reshape(-1, 4).astype(jnp.float32)

    keep = (lbl != -1.0).astype(jnp.float32)
    fg = (lbl == 1.0).astype(jnp.float32)

    lse = jax.scipy.special.logsumexp(score, axis=1)
    chosen = jnp.where(lbl == 1.0, score[:, 1], score[:, 0])
    ce = (lse - chosen) * keep
    loss_cls = jnp.clip(jnp.sum(ce) / jnp.sum(keep), 0.0, 10.0)

    d = jnp.abs((tgt - reg) * iw)
    less = (d < 1.0 / sigma).astype(jnp.float32)
    lr = less * 0.5 * d ** 2 * sigma + (1.0 - less) * (d - 0.5 / sigma)
    lr = lr * ow
    lr = jnp.sum(lr, axis=1) * keep
    loss_reg = jnp.clip(jnp.sum(lr) / (jnp.sum(fg) + 1.0), 0.0, 1.0)
    return loss_cls + loss_reg, loss_cls, loss_reg


if __name__ == "__main__":
    key = jax.random.PRNGKey(0)
    k1, k2, k3, k4, k5 = jax.random.split(key, 5)

    B, H, W = 2, 8, 16          # flattened anchor count N = 2*8*16 = 256
    pre_score = jax.random.normal(k1, (B, H, W, 2), dtype=jnp.float32)
    pre_reg = jax.random.normal(k2, (B, H, W, 4), dtype=jnp.float32)
    rpn_labels = jax.random.randint(k3, (B, H, W), -1, 2).astype(jnp.float32)
    rpn_bbox_targets = jax.random.normal(k4, (B, H, W, 4), dtype=jnp.float32)
    # inside weights: 1 for fg anchors, 0 otherwise (standard RPN convention)
    rpn_bbox_inside_weights = jnp.broadcast_to(
        (rpn_labels == 1.0)[..., None].astype(jnp.float32), (B, H, W, 4))
    # outside weights: small uniform positive value
    rpn_bbox_outside_weights = jnp.full((B, H, W, 4), 1.0 / (B * H * W),
                                        dtype=jnp.float32) * (
        1.0 + 0.1 * jax.random.uniform(k5, (B, H, W, 4)))

    total, cls_l, reg_l = ctpn_loss(
        pre_score, pre_reg, rpn_labels, rpn_bbox_targets,
        rpn_bbox_inside_weights, rpn_bbox_outside_weights, sigma=SIGMA)
    jax.block_until_ready(total)

    ref_total, ref_cls, ref_reg = _reference(
        pre_score, pre_reg, rpn_labels, rpn_bbox_targets,
        rpn_bbox_inside_weights, rpn_bbox_outside_weights, sigma=SIGMA)

    np.testing.assert_allclose(np.asarray(cls_l), np.asarray(ref_cls),
                               rtol=1e-5, atol=1e-5)
    np.testing.assert_allclose(np.asarray(reg_l), np.asarray(ref_reg),
                               rtol=1e-5, atol=1e-5)
    np.testing.assert_allclose(np.asarray(total), np.asarray(ref_total),
                               rtol=1e-5, atol=1e-5)
    print("KERNEL_OK")
</pallas_src>

<mosaic_0001>
module attributes {stable_mosaic.version = 11 : i64} {
  func.func @_ctpn_loss_kernel(%arg0: i32, %arg1: memref<2x256xf32, #tpu.memory_space<vmem>>, %arg2: memref<1x256xf32, #tpu.memory_space<vmem>>, %arg3: memref<2x512xf32, #tpu.memory_space<vmem>>, %arg4: memref<2x512xf32, #tpu.memory_space<vmem>>, %arg5: memref<2x512xf32, #tpu.memory_space<vmem>>, %arg6: memref<2x512xf32, #tpu.memory_space<vmem>>, %arg7: memref<3xf32, #tpu.memory_space<smem>>, %arg8: memref<4x256xf32, #tpu.memory_space<vmem>>, %arg9: memref<2x512xf32, #tpu.memory_space<vmem>>) attributes {dimension_semantics = [#tpu.dimension_semantics<arbitrary>], iteration_bounds = array<i64: 1>, scalar_prefetch = 0 : i64, scratch_operands = 2 : i64, tpu.core_type = #tpu.core_type<tc>, window_params = [{transform_indices = @transform_0, window_bounds = array<i64: 2, 256>}, {transform_indices = @transform_1, window_bounds = array<i64: 1, 256>}, {transform_indices = @transform_2, window_bounds = array<i64: 2, 512>}, {transform_indices = @transform_3, window_bounds = array<i64: 2, 512>}, {transform_indices = @transform_4, window_bounds = array<i64: 2, 512>}, {transform_indices = @transform_5, window_bounds = array<i64: 2, 512>}, {transform_indices = @transform_6, window_bounds = array<i64: 3>}]} {
    %c0_i32 = arith.constant 0 : i32
    %0 = arith.cmpi eq, %arg0, %c0_i32 : i32
    %1 = arith.extui %0 : i1 to i32
    %c0_i32_0 = arith.constant 0 : i32
    %2 = arith.cmpi ne, %1, %c0_i32_0 : i32
    scf.if %2 {
      %cst_38 = arith.constant 0.000000e+00 : f32
      %61 = vector.broadcast %cst_38 : f32 to vector<4x256xf32>
      %c0_39 = arith.constant 0 : index
      %c0_40 = arith.constant 0 : index
      %62 = vector.load %arg8[%c0_39, %c0_40] : memref<4x256xf32, #tpu.memory_space<vmem>>, vector<4x256xf32>
      tpu.vector_store %arg8[%c0_39, %c0_40], %61 {strides = array<i32>} : memref<4x256xf32, #tpu.memory_space<vmem>>, vector<4x256xf32>,
      %cst_41 = arith.constant 0.000000e+00 : f32
      %63 = vector.broadcast %cst_41 : f32 to vector<2x512xf32>
      %c0_42 = arith.constant 0 : index
      %c0_43 = arith.constant 0 : index
      %64 = vector.load %arg9[%c0_42, %c0_43] : memref<2x512xf32, #tpu.memory_space<vmem>>, vector<2x512xf32>
      tpu.vector_store %arg9[%c0_42, %c0_43], %63 {strides = array<i32>} : memref<2x512xf32, #tpu.memory_space<vmem>>, vector<2x512xf32>,
    } else {
    }
    %c0 = arith.constant 0 : index
    %c0_1 = arith.constant 0 : index
    %3 = vector.load %arg2[%c0, %c0_1] : memref<1x256xf32, #tpu.memory_space<vmem>>, vector<1x256xf32>
    %cst = arith.constant -1.000000e+00 : f32
    %4 = vector.broadcast %cst : f32 to vector<1x256xf32>
    %5 = arith.cmpf one, %3, %4 : vector<1x256xf32>
    %6 = arith.extui %5 : vector<1x256xi1> to vector<1x256xi32>
    %7 = arith.sitofp %6 : vector<1x256xi32> to vector<1x256xf32>
    %cst_2 = arith.constant 1.000000e+00 : f32
    %8 = vector.broadcast %cst_2 : f32 to vector<1x256xf32>
    %9 = arith.cmpf oeq, %3, %8 : vector<1x256xf32>
    %10 = arith.extui %9 : vector<1x256xi1> to vector<1x256xi32>
    %11 = arith.sitofp %10 : vector<1x256xi32> to vector<1x256xf32>
    %c0_3 = arith.constant 0 : index
    %c0_4 = arith.constant 0 : index
    %12 = vector.load %arg1[%c0_3, %c0_4] : memref<2x256xf32, #tpu.memory_space<vmem>>, vector<1x256xf32>
    %c1 = arith.constant 1 : index
    %c0_5 = arith.constant 0 : index
    %13 = vector.load %arg1[%c1, %c0_5] : memref<2x256xf32, #tpu.memory_space<vmem>>, vector<1x256xf32>
    %cst_6 = arith.constant 1.000000e+00 : f32
    %14 = vector.broadcast %cst_6 : f32 to vector<1x256xf32>
    %15 = arith.cmpf oeq, %3, %14 : vector<1x256xf32>
    %16 = arith.subf %12, %13 : vector<1x256xf32>
    %17 = arith.subf %13, %12 : vector<1x256xf32>
    %18 = arith.select %15, %16, %17 : vector<1x256xi1>, vector<1x256xf32>
    %cst_7 = arith.constant 0.000000e+00 : f32
    %19 = vector.broadcast %cst_7 : f32 to vector<1x256xf32>
    %20 = arith.maximumf %18, %19 : vector<1x256xf32>
    %21 = math.absf %18 : vector<1x256xf32>
    %cst_8 = arith.constant 0.000000e+00 : f32
    %22 = vector.broadcast %cst_8 : f32 to vector<1x256xf32>
    %23 = arith.subf %22, %21 : vector<1x256xf32>
    %24 = math.exp %23 : vector<1x256xf32>
    %25 = math.log1p %24 : vector<1x256xf32>
    %26 = arith.addf %20, %25 : vector<1x256xf32>
    %27 = arith.mulf %26, %7 : vector<1x256xf32>
    %c0_9 = arith.constant 0 : index
    %c0_10 = arith.constant 0 : index
    %28 = vector.load %arg8[%c0_9, %c0_10] : memref<4x256xf32, #tpu.memory_space<vmem>>, vector<1x256xf32>
    %29 = arith.addf %28, %27 : vector<1x256xf32>
    %c0_11 = arith.constant 0 : index
    %c0_12 = arith.constant 0 : index
    %30 = vector.load %arg8[%c0_11, %c0_12] : memref<4x256xf32, #tpu.memory_space<vmem>>, vector<1x256xf32>
    tpu.vector_store %arg8[%c0_11, %c0_12], %29 {strides = array<i32>} : memref<4x256xf32, #tpu.memory_space<vmem>>, vector<1x256xf32>,
    %c1_13 = arith.constant 1 : index
    %c0_14 = arith.constant 0 : index
    %31 = vector.load %arg8[%c1_13, %c0_14] : memref<4x256xf32, #tpu.memory_space<vmem>>, vector<1x256xf32>
    %32 = arith.addf %31, %7 : vector<1x256xf32>
    %c1_15 = arith.constant 1 : index
    %c0_16 = arith.constant 0 : index
    %33 = vector.load %arg8[%c1_15, %c0_16] : memref<4x256xf32, #tpu.memory_space<vmem>>, vector<1x256xf32>
    tpu.vector_store %arg8[%c1_15, %c0_16], %32 {strides = array<i32>} : memref<4x256xf32, #tpu.memory_space<vmem>>, vector<1x256xf32>,
    %c2 = arith.constant 2 : index
    %c0_17 = arith.constant 0 : index
    %34 = vector.load %arg8[%c2, %c0_17] : memref<4x256xf32, #tpu.memory_space<vmem>>, vector<1x256xf32>
    %35 = arith.addf %34, %11 : vector<1x256xf32>
    %c2_18 = arith.constant 2 : index
    %c0_19 = arith.constant 0 : index
    %36 = vector.load %arg8[%c2_18, %c0_19] : memref<4x256xf32, #tpu.memory_space<vmem>>, vector<1x256xf32>
    tpu.vector_store %arg8[%c2_18, %c0_19], %35 {strides = array<i32>} : memref<4x256xf32, #tpu.memory_space<vmem>>, vector<1x256xf32>,
    %c0_20 = arith.constant 0 : index
    %c0_21 = arith.constant 0 : index
    %37 = vector.load %arg4[%c0_20, %c0_21] : memref<2x512xf32, #tpu.memory_space<vmem>>, vector<2x512xf32>
    %c0_22 = arith.constant 0 : index
    %c0_23 = arith.constant 0 : index
    %38 = vector.load %arg3[%c0_22, %c0_23] : memref<2x512xf32, #tpu.memory_space<vmem>>, vector<2x512xf32>
    %39 = arith.subf %37, %38 : vector<2x512xf32>
    %c0_24 = arith.constant 0 : index
    %c0_25 = arith.constant 0 : index
    %40 = vector.load %arg5[%c0_24, %c0_25] : memref<2x512xf32, #tpu.memory_space<vmem>>, vector<2x512xf32>
    %41 = arith.mulf %39, %40 : vector<2x512xf32>
    %42 = math.absf %41 : vector<2x512xf32>
    %cst_26 = arith.constant 0.111111112 : f32
    %43 = vector.broadcast %cst_26 : f32 to vector<2x512xf32>
    %44 = arith.cmpf olt, %42, %43 : vector<2x512xf32>
    %cst_27 = arith.constant 5.000000e-01 : f32
    %45 = vector.broadcast %cst_27 : f32 to vector<2x512xf32>
    %46 = arith.mulf %45, %42 : vector<2x512xf32>
    %47 = arith.mulf %46, %42 : vector<2x512xf32>
    %cst_28 = arith.constant 9.000000e+00 : f32
    %48 = vector.broadcast %cst_28 : f32 to vector<2x512xf32>
    %49 = arith.mulf %47, %48 : vector<2x512xf32>
    %cst_29 = arith.constant 0.055555556 : f32
    %50 = vector.broadcast %cst_29 : f32 to vector<2x512xf32>
    %51 = arith.subf %42, %50 : vector<2x512xf32>
    %52 = arith.select %44, %49, %51 : vector<2x512xi1>, vector<2x512xf32>
    %c0_30 = arith.constant 0 : index
    %c0_31 = arith.constant 0 : index
    %53 = vector.load %arg9[%c0_30, %c0_31] : memref<2x512xf32, #tpu.memory_space<vmem>>, vector<2x512xf32>
    %c0_32 = arith.constant 0 : index
    %c0_33 = arith.constant 0 : index
    %54 = vector.load %arg6[%c0_32, %c0_33] : memref<2x512xf32, #tpu.memory_space<vmem>>, vector<2x512xf32>
    %55 = arith.mulf %52, %54 : vector<2x512xf32>
    %56 = arith.addf %53, %55 : vector<2x512xf32>
    %c0_34 = arith.constant 0 : index
    %c0_35 = arith.constant 0 : index
    %57 = vector.load %arg9[%c0_34, %c0_35] : memref<2x512xf32, #tpu.memory_space<vmem>>, vector<2x512xf32>
    tpu.vector_store %arg9[%c0_34, %c0_35], %56 {strides = array<i32>} : memref<2x512xf32, #tpu.memory_space<vmem>>, vector<2x512xf32>,
    %c0_i32_36 = arith.constant 0 : i32
    %58 = arith.cmpi eq, %arg0, %c0_i32_36 : i32
    %59 = arith.extui %58 : i1 to i32
    %c0_i32_37 = arith.constant 0 : i32
    %60 = arith.cmpi ne, %59, %c0_i32_37 : i32
    scf.if %60 {
      %c0_38 = arith.constant 0 : index
      %c0_39 = arith.constant 0 : index
      %61 = vector.load %arg8[%c0_38, %c0_39] : memref<4x256xf32, #tpu.memory_space<vmem>>, vector<1x256xf32>
      %62 = vector.shape_cast %61 : vector<1x256xf32> to vector<1x1x256xf32>
      %cst_40 = arith.constant dense<0.000000e+00> : vector<1xf32>
      %63 = vector.multi_reduction <add>, %62, %cst_40 [1, 2] : vector<1x1x256xf32> to vector<1xf32>
      %64 = vector.shape_cast %63 : vector<1xf32> to vector<1x1x1xf32>
      %65 = vector.extract %64[0, 0, 0] : f32 from vector<1x1x1xf32>
      %c1_41 = arith.constant 1 : index
      %c0_42 = arith.constant 0 : index
      %66 = vector.load %arg8[%c1_41, %c0_42] : memref<4x256xf32, #tpu.memory_space<vmem>>, vector<1x256xf32>
      %67 = vector.shape_cast %66 : vector<1x256xf32> to vector<1x1x256xf32>
      %cst_43 = arith.constant dense<0.000000e+00> : vector<1xf32>
      %68 = vector.multi_reduction <add>, %67, %cst_43 [1, 2] : vector<1x1x256xf32> to vector<1xf32>
      %69 = vector.shape_cast %68 : vector<1xf32> to vector<1x1x1xf32>
      %70 = vector.extract %69[0, 0, 0] : f32 from vector<1x1x1xf32>
      %c2_44 = arith.constant 2 : index
      %c0_45 = arith.constant 0 : index
      %71 = vector.load %arg8[%c2_44, %c0_45] : memref<4x256xf32, #tpu.memory_space<vmem>>, vector<1x256xf32>
      %72 = vector.shape_cast %71 : vector<1x256xf32> to vector<1x1x256xf32>
      %cst_46 = arith.constant dense<0.000000e+00> : vector<1xf32>
      %73 = vector.multi_reduction <add>, %72, %cst_46 [1, 2] : vector<1x1x256xf32> to vector<1xf32>
      %74 = vector.shape_cast %73 : vector<1xf32> to vector<1x1x1xf32>
      %75 = vector.extract %74[0, 0, 0] : f32 from vector<1x1x1xf32>
      %c0_47 = arith.constant 0 : index
      %c0_48 = arith.constant 0 : index
      %76 = vector.load %arg9[%c0_47, %c0_48] : memref<2x512xf32, #tpu.memory_space<vmem>>, vector<2x512xf32>
      %77 = vector.shape_cast %76 : vector<2x512xf32> to vector<1x2x512xf32>
      %cst_49 = arith.constant dense<0.000000e+00> : vector<1xf32>
      %78 = vector.multi_reduction <add>, %77, %cst_49 [1, 2] : vector<1x2x512xf32> to vector<1xf32>
      %79 = vector.shape_cast %78 : vector<1xf32> to vector<1x1x1xf32>
      %80 = vector.extract %79[0, 0, 0] : f32 from vector<1x1x1xf32>
      %81 = arith.divf %65, %70 : f32
      %cst_50 = arith.constant 0.000000e+00 : f32
      %cst_51 = arith.constant 1.000000e+01 : f32
      %82 = arith.maximumf %cst_50, %81 : f32
      %83 = arith.minimumf %cst_51, %82 : f32
      %cst_52 = arith.constant 1.000000e+00 : f32
      %84 = arith.addf %75, %cst_52 : f32
      %85 = arith.divf %80, %84 : f32
      %cst_53 = arith.constant 0.000000e+00 : f32
      %cst_54 = arith.constant 1.000000e+00 : f32
      %86 = arith.maximumf %cst_53, %85 : f32
      %87 = arith.minimumf %cst_54, %86 : f32
      %88 = arith.addf %83, %87 : f32
      %c0_55 = arith.constant 0 : index
      %89 = memref.load %arg7[%c0_55] : memref<3xf32, #tpu.memory_space<smem>>
      memref.store %88, %arg7[%c0_55] : memref<3xf32, #tpu.memory_space<smem>>
      %c1_56 = arith.constant 1 : index
      %90 = memref.load %arg7[%c1_56] : memref<3xf32, #tpu.memory_space<smem>>
      memref.store %83, %arg7[%c1_56] : memref<3xf32, #tpu.memory_space<smem>>
      %c2_57 = arith.constant 2 : index
      %91 = memref.load %arg7[%c2_57] : memref<3xf32, #tpu.memory_space<smem>>
      memref.store %87, %arg7[%c2_57] : memref<3xf32, #tpu.memory_space<smem>>
    } else {
    }
    return
  }
  func.func @transform_0(%arg0: i32) -> (i32, i32) {
    %c0_i32 = arith.constant 0 : i32
    %c0_i32_0 = arith.constant 0 : i32
    return %c0_i32, %arg0 : i32, i32
  }
  func.func @transform_1(%arg0: i32) -> (i32, i32) {
    %c0_i32 = arith.constant 0 : i32
    %c0_i32_0 = arith.constant 0 : i32
    return %c0_i32, %arg0 : i32, i32
  }
  func.func @transform_2(%arg0: i32) -> (i32, i32) {
    %c0_i32 = arith.constant 0 : i32
    %c0_i32_0 = arith.constant 0 : i32
    return %arg0, %c0_i32 : i32, i32
  }
  func.func @transform_3(%arg0: i32) -> (i32, i32) {
    %c0_i32 = arith.constant 0 : i32
    %c0_i32_0 = arith.constant 0 : i32
    return %arg0, %c0_i32 : i32, i32
  }
  func.func @transform_4(%arg0: i32) -> (i32, i32) {
    %c0_i32 = arith.constant 0 : i32
    %c0_i32_0 = arith.constant 0 : i32
    return %arg0, %c0_i32 : i32, i32
  }
  func.func @transform_5(%arg0: i32) -> (i32, i32) {
    %c0_i32 = arith.constant 0 : i32
    %c0_i32_0 = arith.constant 0 : i32
    return %arg0, %c0_i32 : i32, i32
  }
  func.func @transform_6(%arg0: i32) -> i32 {
    %c0_i32 = arith.constant 0 : i32
    %c0_i32_0 = arith.constant 0 : i32
    return %c0_i32 : i32
  }
}

</mosaic_0001>

<bundles_post_ra>
// kernel: tpu_custom_call.1
= control target key start
LH: loop header
LB: loop body
LE: loop exit
PB: predicated region body
PF: predicated region fallthrough
CT: control target
= control target key end

     0   :  { %11 = vsyncpa [#allocation5], 0  ;;  %s512_s0 = inlined_call_operand.hbm [shape: f32[2,256], index: 0, kind: input, shape index: {}]   ;;  %s513_s1 = inlined_call_operand.vmem [shape: f32[1,256], index: 1, kind: input, shape index: {}]   ;;  %s514_s2 = inlined_call_operand.hbm [shape: f32[2,512], index: 2, kind: input, shape index: {}]   ;;  %s515_s3 = inlined_call_operand.vmem [shape: f32[2,512], index: 3, kind: input, shape index: {}]   ;;  %s516_s4 = inlined_call_operand.hbm [shape: f32[2,512], index: 4, kind: input, shape index: {}]   ;;  %s517_s5 = inlined_call_operand.vmem [shape: f32[2,512], index: 5, kind: input, shape index: {}]   ;;  %s518_s6 = inlined_call_operand.hbm [shape: f32[3], index: 6, kind: output, shape index: {}]  }
   0x1   :  { %12 = vsyncpa [#allocation8], 0 }
   0x2   :  { %13 = vsyncpa [#allocation6], 0  ;;  %s391_s21 = smov [#allocation7]   ;;  %s392_s23 = smov [#allocation4]  }
   0x3   :  { %s32_s22 = sshll.u32 %s391_s21, 4  ;;  %s20_s24 = sshll.u32 %s392_s23, 4  ;;  %s33_s22 = int_to_ptr.vmem [resolvable:$true] %s32_s22  ;;  %s21_s24 = int_to_ptr.vmem [resolvable:$true] %s20_s24 }
   0x4   :  { %s309_s27 = scalar_lea.hbm %s514_s2, 128 }
   0x5   :  { %p310_p0 = scmp.ne.s32.totalorder %s514_s2, %s309_s27  ;;  %p313_p1 = scmp.lt.u32.totalorder %s309_s27, %s514_s2 }
   0x7   :  { %p315_p2 = pnand %p313_p1, %p310_p0 }
   0x9   :  { %318 = shalt.err (!%p315_p2)
}
   0xa   :  { %s319_s8 = scalar_lea.vmem %s33_s22, 128  ;;  %p324_p4 = scmp.lt.s32.totalorder %s33_s22, %s33_s22 }
   0xb   :  { %p320_p3 = scmp.ne.s32.totalorder %s33_s22, %s319_s8  ;;  %p325_p5 = scmp.lt.s32.totalorder %s319_s8, %s319_s8 }
   0xd   :  { %p326_p6 = por %p325_p5, %p324_p4 }
   0xf   :  { %p327_p7 = pnand %p326_p6, %p320_p3 }
  0x11   :  { %330 = shalt.err (!%p327_p7)
}
  0x12   :  { %35 = dma.hbm_to_vmem [thread:$0]  %s514_s2, 128, %s33_s22, [#allocation8]  }
  0x13   :  { %s331_s13 = scalar_lea.hbm %s512_s0, 64 }
  0x14   :  { %p332_p8 = scmp.ne.s32.totalorder %s512_s0, %s331_s13  ;;  %p335_p9 = scmp.lt.u32.totalorder %s331_s13, %s512_s0 }
  0x16   :  { %p337_p10 = pnand %p335_p9, %p332_p8 }
  0x18   :  { %340 = shalt.err (!%p337_p10)
}
  0x19   :  { %s341_s18 = scalar_lea.vmem %s21_s24, 64  ;;  %p346_p12 = scmp.lt.s32.totalorder %s21_s24, %s21_s24 }
  0x1a   :  { %p342_p11 = scmp.ne.s32.totalorder %s21_s24, %s341_s18  ;;  %p347_p13 = scmp.lt.s32.totalorder %s341_s18, %s341_s18 }
  0x1c   :  { %p348_p0 = por %p347_p13, %p346_p12 }
  0x1e   :  { %p349_p1 = pnand %p348_p0, %p342_p11 }
  0x20   :  { %352 = shalt.err (!%p349_p1)
}
  0x21   :  { %23 = dma.hbm_to_vmem [thread:$0]  %s512_s0, 64, %s21_s24, [#allocation5]  }
  0x22   :  { %s393_s20 = smov [#allocation9]   ;;  %s353_s25 = scalar_lea.hbm %s516_s4, 128 }
  0x23   :  { %s44_s21 = sshll.u32 %s393_s20, 4  ;;  %p354_p2 = scmp.ne.s32.totalorder %s516_s4, %s353_s25  ;;  %s45_s21 = int_to_ptr.vmem [resolvable:$true] %s44_s21 }
  0x24   :  { %p357_p3 = scmp.lt.u32.totalorder %s353_s25, %s516_s4 }
  0x26   :  { %p359_p4 = pnand %p357_p3, %p354_p2 }
  0x28   :  { %362 = shalt.err (!%p359_p4)
}
  0x29   :  { %s363_s30 = scalar_lea.vmem %s45_s21, 128  ;;  %p368_p6 = scmp.lt.s32.totalorder %s45_s21, %s45_s21 }
  0x2a   :  { %p364_p5 = scmp.ne.s32.totalorder %s45_s21, %s363_s30  ;;  %p369_p7 = scmp.lt.s32.totalorder %s363_s30, %s363_s30 }
  0x2c   :  { %p370_p8 = por %p369_p7, %p368_p6 }
  0x2e   :  { %p371_p9 = pnand %p370_p8, %p364_p5 }
  0x30   :  { %374 = shalt.err (!%p371_p9)
}
  0x31   :  { %47 = dma.hbm_to_vmem [thread:$0]  %s516_s4, 128, %s45_s21, [#allocation8]  }
  0x32   :  { %385 = dma.done.wait [#allocation5], 64  }
  0x33   :  { %386 = vsyncadd [#allocation5], 4294967232 }
  0x34   :  { %387 = dma.done.wait [#allocation8], 256  }
  0x35   :  { %388 = vsyncadd [#allocation8], 4294967040  ;;  %v394_v0 = vmov 0.0   ;;  %v96_v1 = vlaneseq  ;;  %v65_v2 = vld [vmem:[%s513_s1] sm:$0x3]  ;;  %v112_v12 = vld [vmem:[#allocation9] sm:$0xff] }
  0x36   :  { %63 = vst [vmem:[#allocation2] sm:$0xff] %v394_v0  ;;  %v72_v3 = vld [vmem:[#allocation4] ss:$2 sm:$0x3]  ;;  %v109_v4 = vld [vmem:[%s515_s3] sm:$0xff]  ;;  %vm66_vm0 = vcmp.ne.f32.partialorder %v65_v2, -1.0 }
  0x37   :  { %vm69_vm1 = vcmp.eq.f32.partialorder %v65_v2, 1.0  ;;  %v74_v5 = vld [vmem:[#allocation4 + $0x1] ss:$2 sm:$0x3]  ;;  %v110_v6 = vld [vmem:[#allocation7] sm:$0xff]  ;;  %vm477_vm2 = vcmp.lt.s32.totalorder %v96_v1, 256 }
  0x38   :  { %v278_v7 = vsel %vm69_vm1, 1.0, %v394_v0  ;;  %v75_v8 = vsub.f32 %v72_v3, %v74_v5  ;;  %v76_v9 = vsub.f32 %v74_v5, %v72_v3  ;;  %v481_v13 = vsel %vm66_vm0, 1.0, %v394_v0  ;;  %v122_v37 = vld [vmem:[%s517_s5] sm:$0xff]  ;;  %s396_s16 = smov 0.0   ;;  %s397_s2 = smov 10.0  }
  0x39   :  { %v111_v16 = vsub.f32 %v109_v4, %v110_v6  ;;  %v132_v20 = vshrl.u32 %v96_v1, 7  ;;  %v395_v22 = vmov 1983009808   ;;  %vm141_vm3 = vcmask 1040384   ;;  %s398_s22 = smov 1.0   ;;  %s375_s28 = scalar_lea.hbm %s518_s6, 16 }
  0x3a   :  { %v77_v17 = vsel %vm69_vm1, %v75_v8, %v76_v9  ;;  %v206_v23 = vunpack.c.l.s4 %v395_v22  ;;  %vm225_vm5 = vcmask 1041408   ;;  %p376_p10 = scmp.ne.s32.totalorder %s518_s6, %s375_s28  ;;  %p379_p11 = scmp.lt.u32.totalorder %s375_s28, %s518_s6 }
  0x3b   :  { %v79_v19 = vand.u32 2147483647, %v77_v17  ;;  %v113_v21 = vmul.f32 %v112_v12, %v111_v16  ;;  %v133_v27 = vsub.s32 0, %v132_v20  ;;  %v137_v28 = vsub.s32 1, %v132_v20 }
  0x3c   :  { %v207_v30 = vunpack.c.0.s8 %v206_v23  ;;  %v78_v63 = vmax.f32 %v77_v17, 0.0  ;;  %p381_p12 = pnand %p379_p11, %p376_p10 }
  0x3d   :  { %v106_v11 = vld [vmem:[#allocation2 + $0x2] ss:$4 sm:$0x3]  ;;  %v102_v15 = vld [vmem:[#allocation2 + $0x1] ss:$4 sm:$0x3] }
  0x3e   :  { %v107_v14 = vadd.f32 %v278_v7, %v106_v11  ;;  %v103_v18 = vadd.f32 %v481_v13, %v102_v15  ;;  %v80_v24 = vsub.f32 0.0, %v79_v19  ;;  %v114_v25 = vand.u32 2147483647, %v113_v21  ;;  %v94_v3 = vld [vmem:[#allocation2] ss:$4 sm:$0x3] }
  0x3f   :  { %v210_v38 = vsub.s32 %v207_v30, %v132_v20 }
  0x40   :  { %108 = vst.msk [vmem:[#allocation2 + $0x2] ss:$4 sm:$0x3] %vm477_vm2, %v107_v14  ;;  %104 = vst.msk [vmem:[#allocation2 + $0x1] ss:$4 sm:$0x3] %vm477_vm2, %v103_v18 }
  0x41   :  { %v81_v26 = vmul.f32 1.442695, %v80_v24  ;;  %v116_v29 = vmul.f32 0.5, %v114_v25  ;;  %v279_v32 = vadd.f32 -0.055555556, %v114_v25 }
  0x42   :  { %vm115_vm4 = vcmp.lt.f32.partialorder %v114_v25, 0.11111111 }
  0x43   :  { %301 = vpow2.f32 %v81_v26  ;;  %v117_v31 = vmul.f32 %v116_v29, %v114_v25 }
  0x45   :  { %v118_v36 = vmul.f32 9.0, %v117_v31 }
  0x47   :  { %v178_v33 = vld [vmem:[#allocation2 + $0x2] ss:$4 sm:$0x3]  ;;  %v120_v41 = vsel %vm115_vm4, %v118_v36, %v279_v32  ;;  %v154_v6 = vld [vmem:[#allocation2 + $0x1] ss:$4 sm:$0x3] }
  0x48   :  { %v183_v34 = vrot.slane %v178_v33, %v133_v27  ;;  %v187_v35 = vrot.slane %v178_v33, %v137_v28  ;;  %v123_v43 = vmul.f32 %v122_v37, %v120_v41  ;;  %v159_v7 = vrot.slane %v154_v6, %v133_v27 }
  0x49   :  { %v163_v8 = vrot.slane %v154_v6, %v137_v28 }
  0x4a   :  { %v190_v39 = vsel %vm141_vm3, %v183_v34, 0.0  ;;  %v191_v40 = vsel %vm141_vm3, %v187_v35, 0.0  ;;  %v204_v44 = vcombine.high %v123_v43, %v123_v43  ;;  %v211_v45 = vrot.slane %v123_v43, %v210_v38 }
  0x4b   :  { %v192_v42 = vadd.f32 %v191_v40, %v190_v39  ;;  %v166_v16 = vsel %vm141_vm3, %v159_v7, 0.0  ;;  %v167_v17 = vsel %vm141_vm3, %v163_v8, 0.0 }
  0x4c   :  { %v218_v46 = vrot.slane %v204_v44, %v210_v38  ;;  %v219_v47 = vcombine.high %v211_v45, %v211_v45  ;;  %v226_v49 = vsel %vm225_vm5, %v211_v45, 0.0 }
  0x4d   :  { %193 = vadd.xlane.f32.xlu1 %v192_v42  ;;  %v302_v48 = vpop.eup %301 }
  0x4e   :  { %v83_v50 = vadd.f32 1.0, %v302_v48  ;;  %v220_v51 = vcombine.high %v218_v46, %v218_v46  ;;  %v227_v52 = vsel %vm225_vm5, %v219_v47, 0.0  ;;  %v229_v53 = vsel %vm225_vm5, %v218_v46, 0.0 }
  0x4f   :  { %v228_v54 = vadd.f32 %v227_v52, %v226_v49  ;;  %v86_v55 = vmul.f32 -0.5, %v302_v48  ;;  %v89_v60 = vand.u32 2147483647, %v302_v48 }
  0x50   :  { %303 = vlog2.f32 %v83_v50  ;;  %v231_v56 = vsel %vm225_vm5, %v220_v51, 0.0 }
  0x51   :  { %v230_v57 = vadd.f32 %v229_v53, %v228_v54  ;;  %v87_v59 = vadd.f32 1.0, %v86_v55  ;;  %vm90_vm6 = vcmp.lt.f32.partialorder %v89_v60, 0.0004427343 }
  0x53   :  { %v232_v58 = vadd.f32 %v231_v56, %v230_v57  ;;  %v88_v61 = vmul.f32 %v302_v48, %v87_v59 }
  0x55   :  { %233 = vadd.xlane.f32.xlu1 %v232_v58 }
  0x5a   :  { %v304_v62 = vpop.eup %303 }
  0x5b   :  { %v85_v0 = vmul.f32 0.6931472, %v304_v62 }
  0x5d   :  { %v91_v1 = vsel %vm90_vm6, %v88_v61, %v85_v0 }
  0x5e   :  { %v92_v2 = vadd.f32 %v91_v1, %v78_v63 }
  0x60   :  { %v93_v4 = vmul.f32 %v481_v13, %v92_v2  ;;  %v168_v13 = vadd.f32 %v167_v17, %v166_v16 }
  0x62   :  { %v95_v5 = vadd.f32 %v94_v3, %v93_v4 }
  0x64   :  { %100 = vst.msk [vmem:[#allocation2] ss:$4 sm:$0x3] %vm477_vm2, %v95_v5 }
  0x6b   :  { %v129_v9 = vld [vmem:[#allocation2] ss:$4 sm:$0x3] }
  0x6c   :  { %v134_v11 = vrot.slane %v129_v9, %v133_v27  ;;  %v138_v12 = vrot.slane %v129_v9, %v137_v28 }
  0x6e   :  { %v142_v14 = vsel %vm141_vm3, %v134_v11, 0.0  ;;  %v143_v15 = vsel %vm141_vm3, %v138_v12, 0.0 }
  0x6f   :  { %v144_v18 = vadd.f32 %v143_v15, %v142_v14 }
  0x71   :  { %145 = vadd.xlane.f32.xlu0 %v144_v18 }
  0x75   :  { %169 = vadd.xlane.f32.xlu0 %v168_v13 }
  0xda   :  { %v194_v10 = vpop.xlane.xlu1 %193 }
  0xdb   :  { %v195_v21 = vrot.slane %v194_v10, 4 }
  0xdd   :  { %v196_v23 = vadd.f32 %v195_v21, %v194_v10 }
  0xdf   :  { %v197_v28 = vrot.slane %v196_v23, 2 }
  0xe1   :  { %v198_v35 = vadd.f32 %v197_v28, %v196_v23 }
  0xe2   :  { %v234_v19 = vpop.xlane.xlu1 %233 }
  0xe3   :  { %v235_v20 = vrot.slane %v234_v19, 4  ;;  %v199_v41 = vrot.slane %v198_v35, 1 }
  0xe5   :  { %v236_v22 = vadd.f32 %v235_v20, %v234_v19  ;;  %v200_v45 = vadd.f32 %v199_v41, %v198_v35 }
  0xe7   :  { %v237_v27 = vrot.slane %v236_v22, 2 }
  0xe9   :  { %v238_v34 = vadd.f32 %v237_v27, %v236_v22 }
  0xeb   :  { %v239_v40 = vrot.slane %v238_v34, 1 }
  0xed   :  { %v240_v44 = vadd.f32 %v239_v40, %v238_v34 }
  0xfe   :  { %v146_v24 = vpop.xlane.xlu0 %145 }
  0xff   :  { %v147_v25 = vrot.slane %v146_v24, 4 }
 0x101   :  { %v148_v26 = vadd.f32 %v147_v25, %v146_v24 }
 0x102   :  { %v170_v29 = vpop.xlane.xlu0 %169 }
 0x103   :  { %v149_v30 = vrot.slane %v148_v26, 2  ;;  %v171_v31 = vrot.slane %v170_v29, 4 }
 0x105   :  { %v172_v32 = vadd.f32 %v171_v31, %v170_v29  ;;  %v150_v33 = vadd.f32 %v149_v30, %v148_v26 }
 0x107   :  { %v173_v36 = vrot.slane %v172_v32, 2  ;;  %v151_v37 = vrot.slane %v150_v33, 1 }
 0x109   :  { %v174_v38 = vadd.f32 %v173_v36, %v172_v32  ;;  %v152_v39 = vadd.f32 %v151_v37, %v150_v33 }
 0x10b   :  { %280 = vpush %v152_v39  ;;  %v175_v42 = vrot.slane %v174_v38, 1 }
 0x10d   :  { %v176_v43 = vadd.f32 %v175_v42, %v174_v38 }
 0x10f   :  { %282 = vpush %v176_v43 }
 0x110   :  { %284 = vpush %v200_v45 }
 0x111   :  { %286 = vpush %v240_v44 }
 0x13c   :  { %s281_s4 = spop %280 }
 0x140   :  { %s283_s5 = spop %282 }
 0x141   :  { %v242_v46 = vstv %s283_s5  ;;  %s285_s11 = spop %284 }
 0x142   :  { %305 = vrcp.f32 %v242_v46  ;;  %s248_s12 = sadd.f32 1.0, %s285_s11  ;;  %s287_s13 = spop %286 }
 0x144   :  { %v249_v47 = vstv %s248_s12 }
 0x145   :  { %307 = vrcp.f32 %v249_v47 }
 0x14c   :  { %v306_v48 = vpop.eup %305 }
 0x14d   :  { %288 = vpush %v306_v48 }
 0x14f   :  { %v308_v49 = vpop.eup %307 }
 0x150   :  { %290 = vpush %v308_v49 }
 0x17e   :  { %s289_s14 = spop %288 }
 0x17f   :  { %s245_s15 = smul.f32 %s289_s14, %s281_s4 }
 0x181   :  { %s246_s17 = smax.f32 %s396_s16, %s245_s15  ;;  %s291_s18 = spop %290 }
 0x182   :  { %s247_s19 = smin.f32 %s397_s2, %s246_s17  ;;  %s252_s20 = smul.f32 %s291_s18, %s287_s13 }
 0x183   :  { %259 = sst [smem:[#allocation10 + $0x1]] %s247_s19 }
 0x184   :  { %s253_s21 = smax.f32 %s396_s16, %s252_s20 }
 0x185   :  { %s254_s23 = smin.f32 %s398_s22, %s253_s21 }
 0x186   :  { %s255_s25 = sadd.f32 %s254_s23, %s247_s19 }
 0x187   :  { %261 = sst [smem:[#allocation10 + $0x2]] %s254_s23 }
 0x188   :  { %257 = sst [smem:[#allocation10]] %s255_s25 }
 0x189   :  { %384 = shalt.err (!%p381_p12)
}
 0x18a   :  { %s399_s7 = smov [#allocation10]  }
 0x18b   :  { %269 = dma.smem_to_hbm %s399_s7, 16, %s518_s6, [#allocation6]  }
 0x18c   :  { %389 = dma.done.wait [#allocation6], 16  }
 0x18d   :  { %390 = vsyncadd [#allocation6], 4294967280 }
 0x18e   :  { %273 = sfence }
 0x18f   :  { %274 = vsyncpa [#allocation5], 1 }
 0x190   :  { %275 = vsyncpa [#allocation8], 1 }
 0x191   :  { %276 = vsyncpa [#allocation6], 1 }

</bundles_post_ra>
